<compile_context>
chip_gen: v7x
topology: tpu7x:2x2x1
jax: 0.10.0
libtpu: 0.0.40
codegen_flags: <defaults>
</compile_context>

<pallas_src>
import functools

import jax
import jax.numpy as jnp
from jax import lax
from jax.experimental import pallas as pl
from jax.experimental.pallas import tpu as pltpu


def _round_up(x, m):
    return ((x + m - 1) // m) * m


# ----------------------------------------------------------------------------
# Pallas kernel: fused  l2norm -> Linear -> (optional) l2norm -> (optional) abs
# Grid: (B_tiles, K_tiles); K is the reduction axis (last, "arbitrary").
# ----------------------------------------------------------------------------
def _encoder_head_kernel(f_ref, w_ref, b_ref, o_ref, ssq_ref, *,
                         no_imgnorm, use_abs, eps):
    # f_ref: [TB, TK] f32   w_ref: [TK, E_pad] bf16   b_ref: [1, E_pad] f32
    # o_ref: [TB, E_pad] f32 (resident accumulator across K)
    # ssq_ref: [TB, 1] f32 scratch (sum of squares of the raw features)
    k = pl.program_id(1)

    @pl.when(k == 0)
    def _init():
        o_ref[...] = jnp.zeros_like(o_ref)
        ssq_ref[...] = jnp.zeros_like(ssq_ref)

    f = f_ref[...].astype(jnp.float32)

    # Accumulate the pre-normalization row sum-of-squares across K tiles.
    ssq_ref[...] += jnp.sum(f * f, axis=1, keepdims=True)

    # MXU matmul: bf16 inputs, f32 accumulation.
    o_ref[...] += jnp.dot(f.astype(jnp.bfloat16), w_ref[...],
                          preferred_element_type=jnp.float32)

    @pl.when(k == pl.num_programs(1) - 1)
    def _finalize():
        # l2norm(f) commutes with the matmul: (f/||f||) @ W == (f @ W) / ||f||.
        inv = lax.rsqrt(ssq_ref[...] + eps)          # EUP rsqrt, no VPU divide
        out = o_ref[...] * inv + b_ref[...]
        if not no_imgnorm:
            inv2 = lax.rsqrt(jnp.sum(out * out, axis=1, keepdims=True) + eps)
            out = out * inv2
        if use_abs:
            out = jnp.abs(out)
        o_ref[...] = out


def encoder_image_head(features, fc_w, fc_b, *, no_imgnorm=False,
                       use_abs=False, block_b=128, block_k=512, eps=1e-12):
    """features: [B, D] f32, fc_w: [D, E] f32, fc_b: [E] f32 -> [B, E] f32."""
    features = features.astype(jnp.float32)
    B, D = features.shape
    Dw, E = fc_w.shape
    assert Dw == D

    # Lane-dense output: pad E up to a multiple of 128 (unmasked stores,
    # full MXU N dimension); slice the padding off after the call.
    E_pad = _round_up(E, 128)
    # Batch tile: multiple of 8 sublanes.
    TB = min(block_b, _round_up(B, 8))
    B_pad = _round_up(B, TB)
    # K tile: multiple of 128 lanes.
    TK = min(block_k, _round_up(D, 128))
    D_pad = _round_up(D, TK)

    # Zero padding is exact: padded rows/cols contribute 0 to every sum/matmul
    # and are sliced away; padded batch rows stay finite thanks to eps.
    f_p = jnp.pad(features, ((0, B_pad - B), (0, D_pad - D)))
    w_p = jnp.pad(fc_w.astype(jnp.bfloat16), ((0, D_pad - D), (0, E_pad - E)))
    b_p = jnp.pad(fc_b.astype(jnp.float32), (0, E_pad - E)).reshape(1, E_pad)

    nb, nk = B_pad // TB, D_pad // TK

    # VMEM budget: double-buffered features (f32) + weights (bf16) + bias +
    # resident output + scratch, with headroom; clamped well under v7x's
    # 64 MiB physical VMEM.
    vmem_bytes = (2 * TB * TK * 4          # features, double-buffered
                  + 2 * TK * E_pad * 2     # weight tile, double-buffered
                  + 2 * E_pad * 4          # bias
                  + 2 * TB * E_pad * 4     # output block
                  + TB * 128 * 4)          # ssq scratch (lane-padded)
    vmem_limit = int(min(max(2 * vmem_bytes, 16 << 20), 48 << 20))

    kernel = functools.partial(_encoder_head_kernel, no_imgnorm=no_imgnorm,
                               use_abs=use_abs, eps=eps)

    out_p = pl.pallas_call(
        kernel,
        out_shape=jax.ShapeDtypeStruct((B_pad, E_pad), jnp.float32),
        grid=(nb, nk),
        in_specs=[
            pl.BlockSpec((TB, TK), lambda i, k: (i, k)),      # features
            pl.BlockSpec((TK, E_pad), lambda i, k: (k, 0)),   # weight (streams over K)
            pl.BlockSpec((1, E_pad), lambda i, k: (0, 0)),    # bias (grid-invariant)
        ],
        out_specs=pl.BlockSpec((TB, E_pad), lambda i, k: (i, 0)),
        scratch_shapes=[pltpu.VMEM((TB, 1), jnp.float32)],
        compiler_params=pltpu.CompilerParams(
            dimension_semantics=("parallel", "arbitrary"),
            vmem_limit_bytes=vmem_limit,
        ),
    )(f_p, w_p, b_p)

    return out_p[:B, :E]


# ----------------------------------------------------------------------------
# Pure-JAX f32 reference for the head (matches the PyTorch forward exactly).
# ----------------------------------------------------------------------------
def encoder_head_ref(features, fc_w, fc_b, *, no_imgnorm=False, use_abs=False):
    f = features / jnp.sqrt(jnp.sum(features * features, axis=1, keepdims=True))
    out = f @ fc_w + fc_b
    if not no_imgnorm:
        out = out / jnp.sqrt(jnp.sum(out * out, axis=1, keepdims=True))
    if use_abs:
        out = jnp.abs(out)
    return out


# ----------------------------------------------------------------------------
# Deterministic stand-in "VGG-like" backbone (plain JAX glue, frozen params)
# ----------------------------------------------------------------------------
def _conv2d_nchw(x, w, b):
    y = lax.conv_general_dilated(
        x, w, window_strides=(1, 1), padding="SAME",
        dimension_numbers=("NCHW", "OIHW", "NCHW"),
    )
    return y + b.reshape(1, -1, 1, 1)


def _maxpool2x2_nchw(x):
    return lax.reduce_window(
        x, -jnp.inf, lax.max,
        window_dimensions=(1, 1, 2, 2),
        window_strides=(1, 1, 2, 2),
        padding="VALID",
    )


def backbone_features(images, params):
    """Scaled-down deterministic stand-in for VGG19 features+classifier[:-1]."""
    x = _conv2d_nchw(images, params["conv1_w"], params["conv1_b"])
    x = jnp.maximum(x, 0.0)
    x = _maxpool2x2_nchw(x)
    x = _conv2d_nchw(x, params["conv2_w"], params["conv2_b"])
    x = jnp.maximum(x, 0.0)
    x = _maxpool2x2_nchw(x)
    B = x.shape[0]
    x = x.reshape(B, -1)                       # flatten (NCHW order, like torch)
    x = x @ params["fc7_w"] + params["fc7_b"]  # stand-in for VGG fc7 (4096-d)
    x = jnp.maximum(x, 0.0) + 1e-3             # keep strictly nonzero norms
    return x.astype(jnp.float32)


def init_params(key, *, in_ch=3, spatial=16, c1=8, c2=16, feat_dim=128,
                embed_size=32):
    ks = jax.random.split(key, 6)
    flat_dim = c2 * (spatial // 4) * (spatial // 4)
    params = {
        "conv1_w": 0.1 * jax.random.normal(ks[0], (c1, in_ch, 3, 3), jnp.float32),
        "conv1_b": jnp.zeros((c1,), jnp.float32),
        "conv2_w": 0.1 * jax.random.normal(ks[1], (c2, c1, 3, 3), jnp.float32),
        "conv2_b": jnp.zeros((c2,), jnp.float32),
        "fc7_w": 0.05 * jax.random.normal(ks[2], (flat_dim, feat_dim), jnp.float32),
        "fc7_b": jnp.zeros((feat_dim,), jnp.float32),
    }
    # self.fc: Xavier-uniform init (init_weights), bias = 0
    r = jnp.sqrt(6.0) / jnp.sqrt(float(feat_dim + embed_size))
    params["fc_w"] = jax.random.uniform(
        ks[3], (feat_dim, embed_size), jnp.float32, minval=-r, maxval=r
    )
    params["fc_b"] = jnp.zeros((embed_size,), jnp.float32)
    return params


def encoder_image_forward(images, params, *, no_imgnorm=False, use_abs=False):
    feats = backbone_features(images, params)
    return encoder_image_head(
        feats, params["fc_w"], params["fc_b"],
        no_imgnorm=no_imgnorm, use_abs=use_abs,
    )


if __name__ == "__main__":
    key = jax.random.PRNGKey(0)
    k_img, k_par = jax.random.split(key)

    B, C, H, W = 2, 3, 16, 16
    embed_size = 32
    images = jax.random.normal(k_img, (B, C, H, W), jnp.float32)  # NCHW
    params = init_params(k_par, in_ch=C, spatial=H, embed_size=embed_size)

    out = encoder_image_forward(images, params, no_imgnorm=False, use_abs=False)
    out = jax.block_until_ready(out)

    assert out.shape == (B, embed_size)
    assert out.dtype == jnp.float32
    assert bool(jnp.all(jnp.isfinite(out)))

    # rows should be unit-norm after the final l2norm
    row_norms = jnp.sqrt(jnp.sum(out * out, axis=1))
    assert bool(jnp.all(jnp.abs(row_norms - 1.0) < 1e-3))

    # check against the pure-JAX f32 reference (kernel uses bf16 matmul inputs)
    feats = backbone_features(images, params)
    ref = encoder_head_ref(feats, params["fc_w"], params["fc_b"],
                           no_imgnorm=False, use_abs=False)
    assert bool(jnp.max(jnp.abs(out - ref)) < 3e-2)

    # exercise the use_abs / no_imgnorm flags too
    out2 = encoder_image_forward(images, params, no_imgnorm=True, use_abs=True)
    out2 = jax.block_until_ready(out2)
    ref2 = encoder_head_ref(feats, params["fc_w"], params["fc_b"],
                            no_imgnorm=True, use_abs=True)
    assert bool(jnp.all(out2 >= 0.0))
    assert bool(jnp.max(jnp.abs(out2 - ref2)) < 3e-2)

    print("KERNEL_OK")
</pallas_src>

<mosaic_0001>
module attributes {stable_mosaic.version = 11 : i64} {
  func.func @_encoder_head_kernel(%arg0: i32, %arg1: i32, %arg2: memref<8x128xf32, #tpu.memory_space<vmem>>, %arg3: memref<128x128xbf16, #tpu.memory_space<vmem>>, %arg4: memref<1x128xf32, #tpu.memory_space<vmem>>, %arg5: memref<8x128xf32, #tpu.memory_space<vmem>>, %arg6: memref<8x1xf32, #tpu.memory_space<vmem>>) attributes {dimension_semantics = [#tpu.dimension_semantics<parallel>, #tpu.dimension_semantics<arbitrary>], iteration_bounds = array<i64: 1, 1>, scalar_prefetch = 0 : i64, scratch_operands = 1 : i64, tpu.core_type = #tpu.core_type<tc>, window_params = [{transform_indices = @transform_0, window_bounds = array<i64: 8, 128>}, {transform_indices = @transform_1, window_bounds = array<i64: 128, 128>}, {pipeline_mode = #tpu.pipeline_mode<synchronous>, transform_indices = @transform_2, window_bounds = array<i64: 1, 128>}, {transform_indices = @transform_3, window_bounds = array<i64: 8, 128>}]} {
    %c0_i32 = arith.constant 0 : i32
    %0 = arith.cmpi eq, %arg1, %c0_i32 : i32
    %1 = arith.extui %0 : i1 to i32
    %c0_i32_0 = arith.constant 0 : i32
    %2 = arith.cmpi ne, %1, %c0_i32_0 : i32
    scf.if %2 {
      %cst_15 = arith.constant 0.000000e+00 : f32
      %19 = vector.broadcast %cst_15 : f32 to vector<8x128xf32>
      %c0_16 = arith.constant 0 : index
      %c0_17 = arith.constant 0 : index
      %20 = vector.load %arg5[%c0_16, %c0_17] : memref<8x128xf32, #tpu.memory_space<vmem>>, vector<8x128xf32>
      tpu.vector_store %arg5[%c0_16, %c0_17], %19 {strides = array<i32>} : memref<8x128xf32, #tpu.memory_space<vmem>>, vector<8x128xf32>,
      %cst_18 = arith.constant 0.000000e+00 : f32
      %21 = vector.broadcast %cst_18 : f32 to vector<8x1xf32>
      %c0_19 = arith.constant 0 : index
      %c0_20 = arith.constant 0 : index
      %22 = vector.load %arg6[%c0_19, %c0_20] : memref<8x1xf32, #tpu.memory_space<vmem>>, vector<8x1xf32>
      tpu.vector_store %arg6[%c0_19, %c0_20], %21 {strides = array<i32>} : memref<8x1xf32, #tpu.memory_space<vmem>>, vector<8x1xf32>,
    } else {
    }
    %c0 = arith.constant 0 : index
    %c0_1 = arith.constant 0 : index
    %3 = vector.load %arg2[%c0, %c0_1] : memref<8x128xf32, #tpu.memory_space<vmem>>, vector<8x128xf32>
    %c0_2 = arith.constant 0 : index
    %c0_3 = arith.constant 0 : index
    %4 = vector.load %arg6[%c0_2, %c0_3] : memref<8x1xf32, #tpu.memory_space<vmem>>, vector<8x1xf32>
    %5 = arith.mulf %3, %3 : vector<8x128xf32>
    %cst = arith.constant dense<0.000000e+00> : vector<8xf32>
    %6 = vector.multi_reduction <add>, %5, %cst [1] : vector<8x128xf32> to vector<8xf32>
    %7 = vector.shape_cast %6 : vector<8xf32> to vector<8x1xf32>
    %8 = arith.addf %4, %7 : vector<8x1xf32>
    %c0_4 = arith.constant 0 : index
    %c0_5 = arith.constant 0 : index
    %9 = vector.load %arg6[%c0_4, %c0_5] : memref<8x1xf32, #tpu.memory_space<vmem>>, vector<8x1xf32>
    tpu.vector_store %arg6[%c0_4, %c0_5], %8 {strides = array<i32>} : memref<8x1xf32, #tpu.memory_space<vmem>>, vector<8x1xf32>,
    %c0_6 = arith.constant 0 : index
    %c0_7 = arith.constant 0 : index
    %10 = vector.load %arg5[%c0_6, %c0_7] : memref<8x128xf32, #tpu.memory_space<vmem>>, vector<8x128xf32>
    %11 = arith.truncf %3 : vector<8x128xf32> to vector<8x128xbf16>
    %c0_8 = arith.constant 0 : index
    %c0_9 = arith.constant 0 : index
    %12 = vector.load %arg3[%c0_8, %c0_9] : memref<128x128xbf16, #tpu.memory_space<vmem>>, vector<128x128xbf16>
    %cst_10 = arith.constant dense<0.000000e+00> : vector<8x128xf32>
    %13 = tpu.matmul %11, %12, %cst_10 {dimension_numbers = #tpu.dot_dimension_numbers<[1], [0], [0], [1], [0, 0, 1, 1], [], []>} : vector<8x128xbf16>, vector<128x128xbf16>, vector<8x128xf32> -> vector<8x128xf32>
    %14 = arith.addf %10, %13 : vector<8x128xf32>
    %c0_11 = arith.constant 0 : index
    %c0_12 = arith.constant 0 : index
    %15 = vector.load %arg5[%c0_11, %c0_12] : memref<8x128xf32, #tpu.memory_space<vmem>>, vector<8x128xf32>
    tpu.vector_store %arg5[%c0_11, %c0_12], %14 {strides = array<i32>} : memref<8x128xf32, #tpu.memory_space<vmem>>, vector<8x128xf32>,
    %c0_i32_13 = arith.constant 0 : i32
    %16 = arith.cmpi eq, %arg1, %c0_i32_13 : i32
    %17 = arith.extui %16 : i1 to i32
    %c0_i32_14 = arith.constant 0 : i32
    %18 = arith.cmpi ne, %17, %c0_i32_14 : i32
    scf.if %18 {
      %c0_15 = arith.constant 0 : index
      %c0_16 = arith.constant 0 : index
      %19 = vector.load %arg6[%c0_15, %c0_16] : memref<8x1xf32, #tpu.memory_space<vmem>>, vector<8x1xf32>
      %cst_17 = arith.constant 9.99999996E-13 : f32
      %20 = vector.broadcast %cst_17 : f32 to vector<8x1xf32>
      %21 = arith.addf %19, %20 : vector<8x1xf32>
      %22 = math.rsqrt %21 : vector<8x1xf32>
      %c0_18 = arith.constant 0 : index
      %c0_19 = arith.constant 0 : index
      %23 = vector.load %arg5[%c0_18, %c0_19] : memref<8x128xf32, #tpu.memory_space<vmem>>, vector<8x128xf32>
      %24 = vector.broadcast %22 : vector<8x1xf32> to vector<8x128xf32>
      %25 = arith.mulf %23, %24 : vector<8x128xf32>
      %c0_20 = arith.constant 0 : index
      %c0_21 = arith.constant 0 : index
      %26 = vector.load %arg4[%c0_20, %c0_21] : memref<1x128xf32, #tpu.memory_space<vmem>>, vector<1x128xf32>
      %27 = vector.broadcast %26 : vector<1x128xf32> to vector<8x128xf32>
      %28 = arith.addf %25, %27 : vector<8x128xf32>
      %29 = arith.mulf %28, %28 : vector<8x128xf32>
      %cst_22 = arith.constant dense<0.000000e+00> : vector<8xf32>
      %30 = vector.multi_reduction <add>, %29, %cst_22 [1] : vector<8x128xf32> to vector<8xf32>
      %31 = vector.shape_cast %30 : vector<8xf32> to vector<8x1xf32>
      %cst_23 = arith.constant 9.99999996E-13 : f32
      %32 = vector.broadcast %cst_23 : f32 to vector<8x1xf32>
      %33 = arith.addf %31, %32 : vector<8x1xf32>
      %34 = math.rsqrt %33 : vector<8x1xf32>
      %35 = vector.broadcast %34 : vector<8x1xf32> to vector<8x128xf32>
      %36 = arith.mulf %28, %35 : vector<8x128xf32>
      %c0_24 = arith.constant 0 : index
      %c0_25 = arith.constant 0 : index
      %37 = vector.load %arg5[%c0_24, %c0_25] : memref<8x128xf32, #tpu.memory_space<vmem>>, vector<8x128xf32>
      tpu.vector_store %arg5[%c0_24, %c0_25], %36 {strides = array<i32>} : memref<8x128xf32, #tpu.memory_space<vmem>>, vector<8x128xf32>,
    } else {
    }
    return
  }
  func.func @transform_0(%arg0: i32, %arg1: i32) -> (i32, i32) {
    %c0_i32 = arith.constant 0 : i32
    return %arg0, %arg1 : i32, i32
  }
  func.func @transform_1(%arg0: i32, %arg1: i32) -> (i32, i32) {
    %c0_i32 = arith.constant 0 : i32
    %c0_i32_0 = arith.constant 0 : i32
    return %arg1, %c0_i32 : i32, i32
  }
  func.func @transform_2(%arg0: i32, %arg1: i32) -> (i32, i32) {
    %c0_i32 = arith.constant 0 : i32
    %c0_i32_0 = arith.constant 0 : i32
    %c0_i32_1 = arith.constant 0 : i32
    return %c0_i32, %c0_i32_0 : i32, i32
  }
  func.func @transform_3(%arg0: i32, %arg1: i32) -> (i32, i32) {
    %c0_i32 = arith.constant 0 : i32
    %c0_i32_0 = arith.constant 0 : i32
    return %arg0, %c0_i32 : i32, i32
  }
}

</mosaic_0001>

<bundles_post_ra>
// kernel: tpu_custom_call.1
= control target key start
LH: loop header
LB: loop body
LE: loop exit
PB: predicated region body
PF: predicated region fallthrough
CT: control target
= control target key end

     0   :  { %8 = vsyncpa [#allocation4], 0  ;;  %s416_s0 = inlined_call_operand.hbm [shape: f32[8,128], index: 0, kind: input, shape index: {}]   ;;  %s417_s1 = inlined_call_operand.hbm [shape: bf16[128,128], index: 1, kind: input, shape index: {}]   ;;  %s418_s2 = inlined_call_operand.vmem [shape: f32[1,128], index: 2, kind: input, shape index: {}]   ;;  %s419_s3 = inlined_call_operand.hbm [shape: f32[8,128], index: 3, kind: output, shape index: {}]  }
   0x1   :  { %9 = vsyncpa [#allocation7], 0 }
   0x2   :  { %10 = vsyncpa [#allocation5], 0  ;;  %s340_s12 = smov [#allocation3]   ;;  %s341_s14 = smov [#allocation6]  }
   0x3   :  { %s17_s13 = sshll.u32 %s340_s12, 4  ;;  %s26_s15 = sshll.u32 %s341_s14, 4  ;;  %s18_s13 = int_to_ptr.vmem [resolvable:$true] %s17_s13  ;;  %s368_s15 = int_to_ptr.vmem [resolvable:$true] %s26_s15 }
   0x4   :  { %s268_s18 = scalar_lea.hbm %s416_s0, 128 }
   0x5   :  { %p269_p0 = scmp.ne.s32.totalorder %s416_s0, %s268_s18  ;;  %p272_p1 = scmp.lt.u32.totalorder %s268_s18, %s416_s0 }
   0x7   :  { %p274_p2 = pnand %p272_p1, %p269_p0 }
   0x9   :  { %277 = shalt.err (!%p274_p2)
}
   0xa   :  { %s278_s23 = scalar_lea.vmem %s18_s13, 128  ;;  %p283_p4 = scmp.lt.s32.totalorder %s18_s13, %s18_s13 }
   0xb   :  { %p279_p3 = scmp.ne.s32.totalorder %s18_s13, %s278_s23  ;;  %p284_p5 = scmp.lt.s32.totalorder %s278_s23, %s278_s23 }
   0xd   :  { %p285_p6 = por %p284_p5, %p283_p4 }
   0xf   :  { %p286_p7 = pnand %p285_p6, %p279_p3 }
  0x11   :  { %289 = shalt.err (!%p286_p7)
}
  0x12   :  { %20 = dma.hbm_to_vmem [thread:$0]  %s416_s0, 128, %s18_s13, [#allocation4]  }
  0x13   :  { %s290_s28 = scalar_lea.hbm %s417_s1, 1024 }
  0x14   :  { %p291_p8 = scmp.ne.s32.totalorder %s417_s1, %s290_s28  ;;  %p294_p9 = scmp.lt.u32.totalorder %s290_s28, %s417_s1 }
  0x16   :  { %p296_p10 = pnand %p294_p9, %p291_p8 }
  0x18   :  { %299 = shalt.err (!%p296_p10)
}
  0x19   :  { %s300_s6 = scalar_lea.vmem %s368_s15, 1024  ;;  %p305_p12 = scmp.lt.s32.totalorder %s368_s15, %s368_s15 }
  0x1a   :  { %p301_p11 = scmp.ne.s32.totalorder %s368_s15, %s300_s6  ;;  %p306_p13 = scmp.lt.s32.totalorder %s300_s6, %s300_s6 }
  0x1c   :  { %p307_p0 = por %p306_p13, %p305_p12 }
  0x1e   :  { %p308_p1 = pnand %p307_p0, %p301_p11 }
  0x20   :  { %311 = shalt.err (!%p308_p1)
}
  0x21   :  { %s342_s0 = smov 64   ;;  %s343_s7 = smov 4  }
  0x22   :  { %32 = dma.hbm_to_vmem [thread:$0]  %s417_s1, 1024, %s368_s15, [#allocation7], %s342_s0, %s342_s0, %s343_s7  }
  0x23   :  { %334 = dma.done.wait [#allocation4], 128  }
  0x24   :  { %335 = vsyncadd [#allocation4], 4294967168 }
  0x25   :  { %336 = dma.done.wait [#allocation7], 1024  }
  0x26   :  { %337 = vsyncadd [#allocation7], 4294966272  ;;  %vm47_vm0 = vcmask 7168   ;;  %v344_v0 = vmov 0.0   ;;  %vm345_vm1 = vmmov 0   ;;  %v49_v1 = vld [vmem:[#allocation3] sm:$0xff] }
  0x27   :  { %227 = vmatprep.subr.bf16.mxu0 %v344_v0  ;;  %243 = vmatprep.mubr.msk.bf16.mxu0 %vm345_vm1, %v344_v0  ;;  %48 = vst.msk [vmem:[#allocation2] sm:$0xff] %vm47_vm0, %v344_v0  ;;  %v51_v2 = vmul.f32 %v49_v1, %v49_v1  ;;  %v256_v3 = vld [vmem:[#allocation6] sm:$0xff]   ;;  %v257_v4 = vld [vmem:[#allocation6 + $0x8] sm:$0xff]   ;;  %v258_v5 = vld [vmem:[#allocation6 + $0x10] sm:$0xff]   ;;  %v346_v9 = vmov 0   ;;  %v58_v12 = vpack.c.bf16 %v49_v1, %v49_v1  ;;  %s347_s11 = smov [#allocation8]  }
  0x28   :  { %228 = vmatpush3.bf16.msra.mxu0 %v256_v3  ;;  %v259_v6 = vld [vmem:[#allocation6 + $0x18] sm:$0xff]   ;;  %v260_v7 = vld [vmem:[#allocation6 + $0x20] sm:$0xff]   ;;  %v261_v8 = vld [vmem:[#allocation6 + $0x28] sm:$0xff]   ;;  %255 = vset.pattern.permute.xlu0 %v346_v9  ;;  %s199_s12 = sshll.u32 %s347_s11, 4  ;;  %s200_s12 = int_to_ptr.vmem [resolvable:$true] %s199_s12 }
  0x29   :  { %52 = vadd.xlane.f32.xlu0 %v51_v2  ;;  %229 = vmatprep.subr.bf16.mxu0 %v344_v0  ;;  %v262_v10 = vld [vmem:[#allocation6 + $0x30] sm:$0xff]   ;;  %v263_v11 = vld [vmem:[#allocation6 + $0x38] sm:$0xff]   ;;  %s312_s13 = scalar_lea.vmem %s200_s12, 128  ;;  %p317_p3 = scmp.lt.s32.totalorder %s200_s12, %s200_s12 }
  0x2a   :  { %v217_v24 = vld [vmem:[%s418_s2] ss:$0 sm:$0xff]  ;;  %p313_p2 = scmp.ne.s32.totalorder %s200_s12, %s312_s13  ;;  %p318_p4 = scmp.lt.s32.totalorder %s312_s13, %s312_s13 }
  0x2c   :  { %230 = vmatpush3.bf16.msra.mxu0 %v257_v4  ;;  %p319_p5 = por %p318_p4, %p317_p3 }
  0x2d   :  { %231 = vmatprep.subr.bf16.mxu0 %v344_v0 }
  0x2e   :  { %v50_v13 = vld [vmem:[#allocation2] sm:$0xff]  ;;  %p320_p6 = pnand %p319_p5, %p313_p2 }
  0x30   :  { %232 = vmatpush3.bf16.msra.mxu0 %v258_v5 }
  0x31   :  { %233 = vmatprep.subr.bf16.mxu0 %v344_v0 }
  0x34   :  { %234 = vmatpush3.bf16.msra.mxu0 %v259_v6 }
  0x35   :  { %235 = vmatprep.subr.bf16.mxu0 %v344_v0 }
  0x38   :  { %236 = vmatpush3.bf16.msra.mxu0 %v260_v7 }
  0x39   :  { %237 = vmatprep.subr.bf16.mxu0 %v344_v0 }
  0x3c   :  { %238 = vmatpush3.bf16.msra.mxu0 %v261_v8 }
  0x3d   :  { %239 = vmatprep.subr.bf16.mxu0 %v344_v0 }
  0x40   :  { %240 = vmatpush3.bf16.msra.mxu0 %v262_v10 }
  0x41   :  { %241 = vmatprep.subr.bf16.mxu0 %v344_v0 }
  0x44   :  { %242 = vmatpush3.bf16.msra.mxu0 %v263_v11 }
  0x47   :  { %244 = vmatmul.mubr.bf16.vlgmr.msra.gmra.mrb[0].mxu0 %v58_v12 }
  0xb6   :  { %v53_v14 = vpop.xlane.xlu0 %52 }
  0xb7   :  { %v54_v15 = vadd.f32 %v53_v14, %v50_v13 }
  0xb9   :  { %56 = vst.msk [vmem:[#allocation2] sm:$0xff] %vm47_vm0, %v54_v15 }
  0xc0   :  { %v168_v16 = vld [vmem:[#allocation2] sm:$0xff] }
  0xc1   :  { %v169_v17 = vadd.f32 1e-12, %v168_v16 }
  0xc3   :  { %264 = vrsqrt.f32 %v169_v17 }
  0xcd   :  { %v265_v18 = vpop.eup %264 }
  0xce   :  { %174 = vperm.xlu0 %255, %v265_v18  }
 0x11a   :  { %v157_v19 = vpop.f32.mrb[0].mxu0 }
 0x11b   :  { %v245_v20 = vpop.f32.mrb[1].mxu0 }
 0x11c   :  { %v160_v21 = vpop.f32.mrb[2].mxu0 }
 0x11d   :  { %v246_v22 = vpop.f32.mrb[3].mxu0 }
 0x14d   :  { %v175_v23 = vpop.permute.xlu0 %174 }
 0x14e   :  { %v177_v25 = vmul.f32 %v175_v23, %v157_v19 }
 0x150   :  { %v185_v26 = vadd.f32 %v217_v24, %v177_v25 }
 0x152   :  { %v186_v27 = vmul.f32 %v185_v26, %v185_v26 }
 0x154   :  { %187 = vadd.xlane.f32.xlu1 %v186_v27 }
 0x1e1   :  { %v188_v28 = vpop.xlane.xlu1 %187 }
 0x1e2   :  { %v189_v29 = vadd.f32 1e-12, %v188_v28 }
 0x1e4   :  { %266 = vrsqrt.f32 %v189_v29 }
 0x1ee   :  { %v267_v30 = vpop.eup %266 }
 0x1ef   :  { %v191_v31 = vmul.f32 %v267_v30, %v185_v26 }
 0x1f1   :  { %192 = vst [vmem:[#allocation8] sm:$0xff] %v191_v31 }
 0x1f2   :  { %323 = shalt.err (!%p320_p6)
}
 0x1f3   :  { %s324_s15 = scalar_lea.hbm %s419_s3, 128 }
 0x1f4   :  { %p325_p7 = scmp.ne.s32.totalorder %s419_s3, %s324_s15  ;;  %p328_p8 = scmp.lt.u32.totalorder %s324_s15, %s419_s3 }
 0x1f6   :  { %p330_p9 = pnand %p328_p8, %p325_p7 }
 0x1f8   :  { %333 = shalt.err (!%p330_p9)
}
 0x1f9   :  { %202 = dma.vmem_to_hbm [thread:$0]  %s200_s12, 128, %s419_s3, [#allocation5]  }
 0x1fa   :  { %338 = dma.done.wait [#allocation5], 128  }
 0x1fb   :  { %339 = vsyncadd [#allocation5], 4294967168 }
 0x1fc   :  { %206 = vsyncpa [#allocation4], 1 }
 0x1fd   :  { %207 = vsyncpa [#allocation7], 1 }
 0x1fe   :  { %208 = vsyncpa [#allocation5], 1 }

</bundles_post_ra>
